<compile_context>
chip_gen: v6e
topology: v6e:2x2x1
jax: 0.10.0
libtpu: 0.0.40
codegen_flags: <defaults>
</compile_context>

<pallas_src>
import functools

import jax
import jax.numpy as jnp
from jax import lax
from jax.experimental import pallas as pl
from jax.experimental.pallas import tpu as pltpu


def _kp2d_loss_kernel(pred_ref, gt_ref, conf_ref, out_ref, acc_ref, *,
                      loss_type, block_rows, valid_rows, mask_tail):
    """One (block_rows, C) dense tile; accumulate into a block-shaped VMEM acc."""
    i = pl.program_id(0)

    @pl.when(i == 0)
    def _():
        acc_ref[...] = jnp.zeros_like(acc_ref)

    pred = pred_ref[...].astype(jnp.float32)
    gt_xy = gt_ref[...].astype(jnp.float32)
    conf = conf_ref[...].astype(jnp.float32)

    diff = pred - gt_xy
    if loss_type == "l1":
        per_elem = jnp.abs(diff)          # nn.L1Loss(reduction='none')
    elif loss_type == "l2":
        per_elem = diff * diff            # nn.MSELoss(reduction='none')
    else:
        raise NotImplementedError("Unsupported loss function")

    contrib = conf * per_elem

    if mask_tail:
        # Only needed when the last row-block is partial: rows beyond
        # `valid_rows` hold stale VMEM data; select them away (VPU-only).
        row = lax.broadcasted_iota(jnp.int32, contrib.shape, 0)
        valid = (i * block_rows + row) < valid_rows
        contrib = jnp.where(valid, contrib, 0.0)

    acc_ref[...] += contrib               # VPU-only steady state (no XLU)

    @pl.when(i == pl.num_programs(0) - 1)
    def _():
        out_ref[0] = jnp.sum(acc_ref[...])   # single final XLU reduction


def _cdiv(a, b):
    return (a + b - 1) // b


def keypoint_2d_loss(pred_keypoints_2d, gt_keypoints_2d, loss_type="l1",
                     lanes=512, max_block_rows=512):
    """Pallas implementation of Keypoint2DLoss.forward (returns a scalar)."""
    assert pred_keypoints_2d.ndim == 3 and pred_keypoints_2d.shape[-1] == 2
    assert gt_keypoints_2d.ndim == 3 and gt_keypoints_2d.shape[-1] == 3
    if loss_type not in ("l1", "l2"):
        raise NotImplementedError("Unsupported loss function")

    B, N, _ = pred_keypoints_2d.shape
    total = B * N * 2                      # flattened, x/y interleaved

    # --- order-preserving relayout (no transposes) --------------------------
    pred_flat = pred_keypoints_2d.astype(jnp.float32).reshape(total)
    gt_xy_flat = gt_keypoints_2d[..., :2].astype(jnp.float32).reshape(total)
    conf_flat = jnp.broadcast_to(
        gt_keypoints_2d[..., 2:3].astype(jnp.float32), (B, N, 2)).reshape(total)

    C = lanes                              # lane width (multiple of 128)
    rows = _cdiv(total, C)
    pad = rows * C - total                 # <= C-1 elements; conf pad = 0
    if pad:
        pred_flat = jnp.pad(pred_flat, (0, pad))
        gt_xy_flat = jnp.pad(gt_xy_flat, (0, pad))
        conf_flat = jnp.pad(conf_flat, (0, pad))

    pred2d = pred_flat.reshape(rows, C)
    gt2d = gt_xy_flat.reshape(rows, C)
    conf2d = conf_flat.reshape(rows, C)

    if rows <= max_block_rows:
        block_rows = rows                  # single block (== full array dims)
    else:
        block_rows = max_block_rows        # multiple of 8 -> (8,128)-legal tile
    grid = (_cdiv(rows, block_rows),)
    mask_tail = (rows % block_rows) != 0   # static; only last block is partial

    kernel = functools.partial(
        _kp2d_loss_kernel, loss_type=loss_type, block_rows=block_rows,
        valid_rows=rows, mask_tail=mask_tail)

    out = pl.pallas_call(
        kernel,
        out_shape=jax.ShapeDtypeStruct((1,), jnp.float32),
        grid_spec=pltpu.PrefetchScalarGridSpec(
            num_scalar_prefetch=0,
            grid=grid,
            in_specs=[
                pl.BlockSpec((block_rows, C), lambda i: (i, 0)),   # pred
                pl.BlockSpec((block_rows, C), lambda i: (i, 0)),   # gt_xy
                pl.BlockSpec((block_rows, C), lambda i: (i, 0)),   # conf
            ],
            out_specs=pl.BlockSpec(memory_space=pltpu.MemorySpace.SMEM),
            scratch_shapes=[pltpu.VMEM((block_rows, C), jnp.float32)],
        ),
        compiler_params=pltpu.CompilerParams(
            dimension_semantics=("arbitrary",)),      # sequential reduction axis
    )(pred2d, gt2d, conf2d)
    return out[0]


def _reference(pred, gt, loss_type="l1"):
    """Pure-JAX transliteration of the PyTorch forward, for verification."""
    conf = gt[:, :, -1][..., None]
    d = pred - gt[:, :, :-1]
    per_elem = jnp.abs(d) if loss_type == "l1" else d * d
    return (conf * per_elem).sum(axis=(1, 2)).sum()


if __name__ == "__main__":
    key = jax.random.PRNGKey(0)
    k_pred, k_gt, k_conf = jax.random.split(key, 3)

    B, N = 2, 16  # batch, num_keypoints
    pred = jax.random.normal(k_pred, (B, N, 2), dtype=jnp.float32)
    gt_xy = jax.random.normal(k_gt, (B, N, 2), dtype=jnp.float32)
    conf = jax.random.uniform(k_conf, (B, N, 1), dtype=jnp.float32)
    gt = jnp.concatenate([gt_xy, conf], axis=-1)               # [B, N, 3]

    for lt in ("l1", "l2"):
        loss = keypoint_2d_loss(pred, gt, loss_type=lt)
        loss = jax.block_until_ready(loss)
        ref = _reference(pred, gt, loss_type=lt)
        assert bool(jnp.allclose(loss, ref, rtol=1e-5, atol=1e-5)), (lt, loss, ref)

    print("KERNEL_OK")
</pallas_src>

<mosaic_0001>
module attributes {stable_mosaic.version = 11 : i64} {
  func.func @_kp2d_loss_kernel(%arg0: i32, %arg1: memref<1x512xf32, #tpu.memory_space<vmem>>, %arg2: memref<1x512xf32, #tpu.memory_space<vmem>>, %arg3: memref<1x512xf32, #tpu.memory_space<vmem>>, %arg4: memref<1xf32, #tpu.memory_space<smem>>, %arg5: memref<1x512xf32, #tpu.memory_space<vmem>>) attributes {dimension_semantics = [#tpu.dimension_semantics<arbitrary>], iteration_bounds = array<i64: 1>, scalar_prefetch = 0 : i64, scratch_operands = 1 : i64, tpu.core_type = #tpu.core_type<tc>, window_params = [{transform_indices = @transform_0, window_bounds = array<i64: 1, 512>}, {transform_indices = @transform_1, window_bounds = array<i64: 1, 512>}, {transform_indices = @transform_2, window_bounds = array<i64: 1, 512>}, {transform_indices = @transform_3, window_bounds = array<i64: 1>}]} {
    %c0_i32 = arith.constant 0 : i32
    %0 = arith.cmpi eq, %arg0, %c0_i32 : i32
    %1 = arith.extui %0 : i1 to i32
    %c0_i32_0 = arith.constant 0 : i32
    %2 = arith.cmpi ne, %1, %c0_i32_0 : i32
    scf.if %2 {
      %cst = arith.constant 0.000000e+00 : f32
      %15 = vector.broadcast %cst : f32 to vector<1x512xf32>
      %c0_12 = arith.constant 0 : index
      %c0_13 = arith.constant 0 : index
      %16 = vector.load %arg5[%c0_12, %c0_13] : memref<1x512xf32, #tpu.memory_space<vmem>>, vector<1x512xf32>
      tpu.vector_store %arg5[%c0_12, %c0_13], %15 {strides = array<i32>} : memref<1x512xf32, #tpu.memory_space<vmem>>, vector<1x512xf32>,
    } else {
    }
    %c0 = arith.constant 0 : index
    %c0_1 = arith.constant 0 : index
    %3 = vector.load %arg1[%c0, %c0_1] : memref<1x512xf32, #tpu.memory_space<vmem>>, vector<1x512xf32>
    %c0_2 = arith.constant 0 : index
    %c0_3 = arith.constant 0 : index
    %4 = vector.load %arg2[%c0_2, %c0_3] : memref<1x512xf32, #tpu.memory_space<vmem>>, vector<1x512xf32>
    %c0_4 = arith.constant 0 : index
    %c0_5 = arith.constant 0 : index
    %5 = vector.load %arg3[%c0_4, %c0_5] : memref<1x512xf32, #tpu.memory_space<vmem>>, vector<1x512xf32>
    %6 = arith.subf %3, %4 : vector<1x512xf32>
    %7 = math.absf %6 : vector<1x512xf32>
    %8 = arith.mulf %5, %7 : vector<1x512xf32>
    %c0_6 = arith.constant 0 : index
    %c0_7 = arith.constant 0 : index
    %9 = vector.load %arg5[%c0_6, %c0_7] : memref<1x512xf32, #tpu.memory_space<vmem>>, vector<1x512xf32>
    %10 = arith.addf %9, %8 : vector<1x512xf32>
    %c0_8 = arith.constant 0 : index
    %c0_9 = arith.constant 0 : index
    %11 = vector.load %arg5[%c0_8, %c0_9] : memref<1x512xf32, #tpu.memory_space<vmem>>, vector<1x512xf32>
    tpu.vector_store %arg5[%c0_8, %c0_9], %10 {strides = array<i32>} : memref<1x512xf32, #tpu.memory_space<vmem>>, vector<1x512xf32>,
    %c0_i32_10 = arith.constant 0 : i32
    %12 = arith.cmpi eq, %arg0, %c0_i32_10 : i32
    %13 = arith.extui %12 : i1 to i32
    %c0_i32_11 = arith.constant 0 : i32
    %14 = arith.cmpi ne, %13, %c0_i32_11 : i32
    scf.if %14 {
      %c0_12 = arith.constant 0 : index
      %c0_13 = arith.constant 0 : index
      %15 = vector.load %arg5[%c0_12, %c0_13] : memref<1x512xf32, #tpu.memory_space<vmem>>, vector<1x512xf32>
      %16 = vector.shape_cast %15 : vector<1x512xf32> to vector<1x1x512xf32>
      %cst = arith.constant dense<0.000000e+00> : vector<1xf32>
      %17 = vector.multi_reduction <add>, %16, %cst [1, 2] : vector<1x1x512xf32> to vector<1xf32>
      %18 = vector.shape_cast %17 : vector<1xf32> to vector<1x1x1xf32>
      %19 = vector.extract %18[0, 0, 0] : f32 from vector<1x1x1xf32>
      %c0_14 = arith.constant 0 : index
      %20 = memref.load %arg4[%c0_14] : memref<1xf32, #tpu.memory_space<smem>>
      memref.store %19, %arg4[%c0_14] : memref<1xf32, #tpu.memory_space<smem>>
    } else {
    }
    return
  }
  func.func @transform_0(%arg0: i32) -> (i32, i32) {
    %c0_i32 = arith.constant 0 : i32
    %c0_i32_0 = arith.constant 0 : i32
    return %arg0, %c0_i32 : i32, i32
  }
  func.func @transform_1(%arg0: i32) -> (i32, i32) {
    %c0_i32 = arith.constant 0 : i32
    %c0_i32_0 = arith.constant 0 : i32
    return %arg0, %c0_i32 : i32, i32
  }
  func.func @transform_2(%arg0: i32) -> (i32, i32) {
    %c0_i32 = arith.constant 0 : i32
    %c0_i32_0 = arith.constant 0 : i32
    return %arg0, %c0_i32 : i32, i32
  }
  func.func @transform_3(%arg0: i32) -> i32 {
    %c0_i32 = arith.constant 0 : i32
    %c0_i32_0 = arith.constant 0 : i32
    return %c0_i32 : i32
  }
}

</mosaic_0001>

<bundles_post_ra>
// kernel: tpu_custom_call.1
= control target key start
LH: loop header
LB: loop body
LE: loop exit
PB: predicated region body
PF: predicated region fallthrough
CT: control target
= control target key end

     0   :  { %8 = vsyncpa [#allocation4], 0  ;;  %s249_s0 = inlined_call_operand.hbm [shape: f32[1,512], index: 0, kind: input, shape index: {}]   ;;  %s250_s1 = inlined_call_operand.hbm [shape: f32[1,512], index: 1, kind: input, shape index: {}]   ;;  %s251_s2 = inlined_call_operand.hbm [shape: f32[1,512], index: 2, kind: input, shape index: {}]   ;;  %s252_s3 = inlined_call_operand.hbm [shape: f32[1], index: 3, kind: output, shape index: {}]  }
   0x1   :  { %9 = vsyncpa [#allocation7], 0 }
   0x2   :  { %10 = vsyncpa [#allocation5], 0  ;;  %s212_s12 = smov [#allocation6]   ;;  %s213_s14 = smov [#allocation3]  }
   0x3   :  { %s27_s13 = sshll.u32 %s212_s12, 4  ;;  %s17_s15 = sshll.u32 %s213_s14, 4  ;;  %s28_s13 = int_to_ptr.vmem [resolvable:$true] %s27_s13  ;;  %s18_s15 = int_to_ptr.vmem [resolvable:$true] %s17_s15 }
   0x4   :  { %s146_s16 = scalar_lea.vmem %s28_s13, 64  ;;  %p151_p1 = scmp.lt.s32.totalorder %s28_s13, %s28_s13 }
   0x5   :  { %p147_p0 = scmp.ne.s32.totalorder %s28_s13, %s146_s16  ;;  %p152_p2 = scmp.lt.s32.totalorder %s146_s16, %s146_s16 }
   0x7   :  { %p153_p3 = por %p152_p2, %p151_p1 }
   0x9   :  { %p154_p4 = pnand %p153_p3, %p147_p0 }
   0xb   :  { %157 = shalt.err (!%p154_p4)
}
   0xc   :  { %30 = dma.hbm_to_vmem [thread:$0]  %s250_s1, 64, %s28_s13, [#allocation7]  }
   0xd   :  { %s166_s19 = scalar_lea.vmem %s18_s15, 64  ;;  %p171_p6 = scmp.lt.s32.totalorder %s18_s15, %s18_s15 }
   0xe   :  { %p167_p5 = scmp.ne.s32.totalorder %s18_s15, %s166_s19  ;;  %p172_p7 = scmp.lt.s32.totalorder %s166_s19, %s166_s19 }
  0x10   :  { %p173_p8 = por %p172_p7, %p171_p6 }
  0x12   :  { %p174_p9 = pnand %p173_p8, %p167_p5 }
  0x14   :  { %177 = shalt.err (!%p174_p9)
}
  0x15   :  { %20 = dma.hbm_to_vmem [thread:$0]  %s249_s0, 64, %s18_s15, [#allocation4]  }
  0x16   :  { %s214_s22 = smov [#allocation8]  }
  0x17   :  { %s37_s23 = sshll.u32 %s214_s22, 4  ;;  %s38_s23 = int_to_ptr.vmem [resolvable:$true] %s37_s23 }
  0x18   :  { %s186_s24 = scalar_lea.vmem %s38_s23, 64  ;;  %p191_p11 = scmp.lt.s32.totalorder %s38_s23, %s38_s23 }
  0x19   :  { %p187_p10 = scmp.ne.s32.totalorder %s38_s23, %s186_s24  ;;  %p192_p12 = scmp.lt.s32.totalorder %s186_s24, %s186_s24 }
  0x1b   :  { %p193_p13 = por %p192_p12, %p191_p11 }
  0x1d   :  { %p194_p0 = pnand %p193_p13, %p187_p10 }
  0x1f   :  { %197 = shalt.err (!%p194_p0)
}
  0x20   :  { %40 = dma.hbm_to_vmem [thread:$0]  %s251_s2, 64, %s38_s23, [#allocation7]  }
  0x21   :  { %206 = dma.done.wait [#allocation4], 64  }
  0x22   :  { %207 = vsyncadd [#allocation4], 4294967232 }
  0x23   :  { %208 = dma.done.wait [#allocation7], 128  }
  0x24   :  { %209 = vsyncadd [#allocation7], 4294967168  ;;  %v54_v0 = vlaneseq  ;;  %v215_v1 = vmov 0.0   ;;  %v59_v2 = vld [vmem:[#allocation3] sm:$0xf]  ;;  %vm97_vm1 = vcmask 1040384  }
  0x25   :  { %v60_v3 = vld [vmem:[#allocation6] sm:$0xf]  ;;  %v61_v5 = vld [vmem:[#allocation8] sm:$0xf]  ;;  %s216_s2 = smov [#allocation9]  }
  0x26   :  { %vm56_vm0 = vcmp.lt.s32.totalorder %v54_v0, 512  ;;  %v62_v4 = vsub.f32 %v59_v2, %v60_v3  ;;  %v78_v10 = vshrl.u32 %v54_v0, 7 }
  0x27   :  { %58 = vst.msk [vmem:[#allocation2] sm:$0xf] %vm56_vm0, %v215_v1 }
  0x28   :  { %v63_v6 = vand.u32 2147483647, %v62_v4  ;;  %v79_v11 = vsub.s32 0, %v78_v10  ;;  %v83_v12 = vsub.s32 1, %v78_v10  ;;  %v87_v13 = vsub.s32 2, %v78_v10 }
  0x29   :  { %v91_v14 = vsub.s32 3, %v78_v10 }
  0x2a   :  { %v64_v8 = vmul.f32 %v63_v6, %v61_v5 }
  0x2e   :  { %v65_v7 = vld [vmem:[#allocation2] sm:$0xf] }
  0x2f   :  { %v66_v9 = vadd.f32 %v65_v7, %v64_v8 }
  0x31   :  { %71 = vst.msk [vmem:[#allocation2] sm:$0xf] %vm56_vm0, %v66_v9 }
  0x38   :  { %v75_v15 = vld [vmem:[#allocation2] sm:$0xf] }
  0x39   :  { %v80_v16 = vrot.slane %v75_v15, %v79_v11  ;;  %v84_v17 = vrot.slane %v75_v15, %v83_v12  ;;  %v88_v18 = vrot.slane %v75_v15, %v87_v13  ;;  %v92_v19 = vrot.slane %v75_v15, %v91_v14 }
  0x3b   :  { %v98_v20 = vsel %vm97_vm1, %v80_v16, 0.0  ;;  %v99_v21 = vsel %vm97_vm1, %v84_v17, 0.0  ;;  %v101_v22 = vsel %vm97_vm1, %v88_v18, 0.0  ;;  %v103_v24 = vsel %vm97_vm1, %v92_v19, 0.0 }
  0x3c   :  { %v100_v23 = vadd.f32 %v99_v21, %v98_v20 }
  0x3e   :  { %v102_v25 = vadd.f32 %v101_v22, %v100_v23 }
  0x40   :  { %v104_v26 = vadd.f32 %v103_v24, %v102_v25 }
  0x42   :  { %105 = vadd.xlane.f32.xlu0 %v104_v26 }
  0xcb   :  { %v106_v27 = vpop.xlane.xlu0 %105 }
  0xcc   :  { %v107_v28 = vrot.slane %v106_v27, 4 }
  0xce   :  { %v108_v29 = vadd.f32 %v107_v28, %v106_v27 }
  0xd0   :  { %v109_v30 = vrot.slane %v108_v29, 2 }
  0xd2   :  { %v110_v31 = vadd.f32 %v109_v30, %v108_v29 }
  0xd4   :  { %v111_v32 = vrot.slane %v110_v31, 1 }
  0xd6   :  { %v112_v33 = vadd.f32 %v111_v32, %v110_v31 }
  0xd8   :  { %131 = vpush %v112_v33 }
 0x109   :  { %s132_s0 = spop %131 }
 0x10a   :  { %115 = sst [smem:[#allocation9]] %s132_s0 }
 0x10b   :  { %123 = dma.smem_to_hbm %s216_s2, 16, %s252_s3, [#allocation5]  }
 0x10c   :  { %210 = dma.done.wait [#allocation5], 16  }
 0x10d   :  { %211 = vsyncadd [#allocation5], 4294967280 }
 0x10e   :  { %127 = sfence }
 0x10f   :  { %128 = vsyncpa [#allocation4], 1 }
 0x110   :  { %129 = vsyncpa [#allocation7], 1 }
 0x111   :  { %130 = vsyncpa [#allocation5], 1 }

</bundles_post_ra>
